<compile_context>
chip_gen: v7x
topology: tpu7x:2x2x1
jax: 0.10.0
libtpu: 0.0.40
codegen_flags: <defaults>
</compile_context>

<pallas_src>
import jax
import jax.numpy as jnp
from jax.experimental import pallas as pl
from jax.experimental.pallas import tpu as pltpu


def _iim_kernel(fsp_ref, fcp_ref, wa_a_ref, wa_b_ref, b_att_ref,
                w1_a_ref, w1_b_ref, b1_ref, o_ref):
    # Blocks: fsp_ref (1,c1,hw), fcp_ref (1,c2,hw), o_ref (1,c,hw),
    #         weights (c,c1)/(c,c2) with BN scale pre-folded, biases (c,1).
    c1 = fsp_ref.shape[1]
    c = o_ref.shape[1]
    hw = o_ref.shape[2]

    xa = fsp_ref[0]                                           # (c1, hw) f32
    xb = fcp_ref[0]                                           # (c2, hw) f32

    # Global average pool: one cross-lane reduce per half (XLU slot),
    # 1/hw folded in as a constant.  The channel concat is never materialised.
    inv_hw = 1.0 / hw
    gap_a = jnp.sum(xa, axis=1, keepdims=True) * inv_hw       # (c1, 1)
    gap_b = jnp.sum(xb, axis=1, keepdims=True) * inv_hw       # (c2, 1)

    # Attention branch: 1x1 conv with the BN scale already folded into the
    # (column-split) weights, BN shift, sigmoid.
    att = (jnp.dot(wa_a_ref[...], gap_a, preferred_element_type=jnp.float32)
           + jnp.dot(wa_b_ref[...], gap_b, preferred_element_type=jnp.float32)
           + b_att_ref[...])
    att = jax.nn.sigmoid(att)                                  # (c, 1)

    # Reorient att from sublanes (c,1) to lanes (1,c) so it can be folded into
    # the conv1 columns.  iota/where/sublane-reduce is a guaranteed-lowerable
    # "small transpose" (cost ~c^2 VPU ops + one XLU reduce).
    ri = jax.lax.broadcasted_iota(jnp.int32, (c, c), 0)
    ci = jax.lax.broadcasted_iota(jnp.int32, (c, c), 1)
    att_row = jnp.sum(jnp.where(ri == ci, att, 0.0),
                      axis=0, keepdims=True)                   # (1, c)

    # Main branch: attention (and BN scale, pre-folded) scale the conv1
    # columns; the two half-matmuls realise both the channel concat and the
    # 1x1 conv.  Contraction over channels (sublanes), HW stays on lanes.
    w1_a = w1_a_ref[...] * att_row[:, 0:c1]                    # (c, c1)
    w1_b = w1_b_ref[...] * att_row[:, c1:c]                    # (c, c2)
    out1 = (jnp.dot(w1_a, xa, preferred_element_type=jnp.float32)
            + jnp.dot(w1_b, xb, preferred_element_type=jnp.float32)
            + b1_ref[...])                                     # (c, hw)

    # Residual with the (virtual) concat + ReLU; per-half stores land on
    # sublane offsets 0 and c1 (keep c1 a multiple of 8 for unmasked vst).
    o_ref[0, 0:c1, :] = jnp.maximum(out1[0:c1, :] + xa, 0.0).astype(o_ref.dtype)
    o_ref[0, c1:c, :] = jnp.maximum(out1[c1:c, :] + xb, 0.0).astype(o_ref.dtype)


def iim_forward(fsp, fcp, params):
    """fsp, fcp: NCHW float32 arrays. Returns NCHW output."""
    n, c1, h, w = fsp.shape
    c2 = fcp.shape[1]
    c = c1 + c2
    hw = h * w

    # Free reshapes only (row-major contiguous): NCHW -> (N, C, H*W).
    # HW maps to the TPU lane axis; channels sit on sublanes.
    fsp_r = fsp.reshape(n, c1, hw)
    fcp_r = fcp.reshape(n, c2, hw)

    # BN folded to per-channel scale/shift (inference form).
    def bn_fold(gamma, beta, mean, var, eps=1e-5):
        scale = gamma / jnp.sqrt(var + eps)
        shift = beta - mean * scale
        return scale, shift

    s_att, b_att = bn_fold(*params["bn"])
    s1, b1 = bn_fold(*params["bn1"])

    # Fold BN scales into the 1x1-conv weights (rows = output channels) and
    # split the columns (= input channels) at the fsp/fcp boundary.  All free
    # one-time XLA work outside the kernel.
    w_att_eff = params["w_conv"] * s_att[:, None]              # (C, C)
    w1_eff = params["w_conv1"] * s1[:, None]                   # (C, C)
    wa_a, wa_b = w_att_eff[:, :c1], w_att_eff[:, c1:]          # (C,c1), (C,c2)
    w1_a, w1_b = w1_eff[:, :c1], w1_eff[:, c1:]
    b_att_col = b_att.reshape(c, 1)
    b1_col = b1.reshape(c, 1)

    vec_spec = pl.BlockSpec((c, 1), lambda b: (0, 0))
    wa_spec = pl.BlockSpec((c, c1), lambda b: (0, 0))
    wb_spec = pl.BlockSpec((c, c2), lambda b: (0, 0))

    # Explicit VMEM budget: double-buffered in/out tiles + resident constants,
    # clamped to 48 MiB so the plan stays inside v7x's 64 MiB physical VMEM
    # while exceeding v5e's 16 MiB scoped default.
    step_bytes = 4 * hw * (c1 + c2 + c)
    const_bytes = 4 * (2 * c * (c1 + c2) + 2 * c)
    vmem_limit = int(min(48 * 1024 * 1024,
                         max(16 * 1024 * 1024, 4 * step_bytes + 4 * const_bytes)))

    y = pl.pallas_call(
        _iim_kernel,
        out_shape=jax.ShapeDtypeStruct((n, c, hw), jnp.float32),
        grid_spec=pltpu.PrefetchScalarGridSpec(
            num_scalar_prefetch=0,
            grid=(n,),
            in_specs=[
                pl.BlockSpec((1, c1, hw), lambda b: (b, 0, 0)),   # fsp
                pl.BlockSpec((1, c2, hw), lambda b: (b, 0, 0)),   # fcp
                wa_spec, wb_spec,                                 # attention conv (BN-folded, split)
                vec_spec,                                         # attention BN shift
                wa_spec, wb_spec,                                 # conv1 (BN-folded, split)
                vec_spec,                                         # bn1 shift
            ],
            out_specs=pl.BlockSpec((1, c, hw), lambda b: (b, 0, 0)),
        ),
        compiler_params=pltpu.CompilerParams(
            dimension_semantics=("parallel",),
            vmem_limit_bytes=vmem_limit),
    )(fsp_r, fcp_r, wa_a, wa_b, b_att_col, w1_a, w1_b, b1_col)

    # Free reshape back to NCHW (no transpose).
    return y.reshape(n, c, h, w)


def init_params(key, out_channels):
    """Deterministic synthetic init matching IIM.__init__ shapes.

    BN running stats are made non-trivial so the scale/shift folding is
    actually exercised against the unfused reference.
    """
    c = out_channels
    k1, k2, k3, k4 = jax.random.split(key, 4)
    # kaiming_normal_(a=1): std = sqrt(2 / ((1 + a^2) * fan_in)) = sqrt(1 / fan_in)
    std = (1.0 / c) ** 0.5
    w_conv = jax.random.normal(k1, (c, c), jnp.float32) * std    # self.conv  (1x1, no bias)
    w_conv1 = jax.random.normal(k2, (c, c), jnp.float32) * std   # self.conv1 (1x1, no bias)

    def bn_init(k):
        kg, kb, km, kv = jax.random.split(k, 4)
        gamma = 1.0 + 0.1 * jax.random.normal(kg, (c,), jnp.float32)
        beta = 0.1 * jax.random.normal(kb, (c,), jnp.float32)
        mean = 0.1 * jax.random.normal(km, (c,), jnp.float32)
        var = 1.0 + 0.1 * jnp.abs(jax.random.normal(kv, (c,), jnp.float32))
        return (gamma, beta, mean, var)

    return {"w_conv": w_conv, "w_conv1": w_conv1,
            "bn": bn_init(k3), "bn1": bn_init(k4)}


def iim_reference(fsp, fcp, params):
    """Pure-JAX reference mirroring the PyTorch forward (inference BN, unfused)."""
    out = jnp.concatenate([fsp, fcp], axis=1)                       # (N,C,H,W)
    gap = jnp.mean(out, axis=(2, 3))                                # (N,C)
    att = gap @ params["w_conv"].T                                  # (N,C)
    g, b, m, v = params["bn"]
    att = (att - m) / jnp.sqrt(v + 1e-5) * g + b
    att = jax.nn.sigmoid(att)[:, :, None, None]
    out1 = out * att
    out1 = jnp.einsum("nchw,oc->nohw", out1, params["w_conv1"])
    g1, b1, m1, v1 = params["bn1"]
    out1 = (out1 - m1[None, :, None, None]) / jnp.sqrt(v1 + 1e-5)[None, :, None, None]
    out1 = out1 * g1[None, :, None, None] + b1[None, :, None, None]
    return jax.nn.relu(out1 + out)


if __name__ == "__main__":
    key = jax.random.PRNGKey(0)
    k_fsp, k_fcp, k_par = jax.random.split(key, 3)

    # C_half multiple of 8 so the per-half residual stores stay sublane-aligned.
    N, C_half, H, W = 2, 8, 16, 16
    out_channels = 2 * C_half  # channel-concat must match conv channel count

    fsp = jax.random.normal(k_fsp, (N, C_half, H, W), jnp.float32)
    fcp = jax.random.normal(k_fcp, (N, C_half, H, W), jnp.float32)
    params = init_params(k_par, out_channels)

    y = iim_forward(fsp, fcp, params)
    y = jax.block_until_ready(y)

    y_ref = iim_reference(fsp, fcp, params)
    assert y.shape == (N, out_channels, H, W)
    assert jnp.max(jnp.abs(y - y_ref)) < 2e-4, "mismatch vs reference"

    print("KERNEL_OK")
</pallas_src>

<mosaic_0001>
module attributes {stable_mosaic.version = 11 : i64} {
  func.func @_iim_kernel(%arg0: i32, %arg1: memref<1x8x256xf32, #tpu.memory_space<vmem>>, %arg2: memref<1x8x256xf32, #tpu.memory_space<vmem>>, %arg3: memref<16x8xf32, #tpu.memory_space<vmem>>, %arg4: memref<16x8xf32, #tpu.memory_space<vmem>>, %arg5: memref<16x1xf32, #tpu.memory_space<vmem>>, %arg6: memref<16x8xf32, #tpu.memory_space<vmem>>, %arg7: memref<16x8xf32, #tpu.memory_space<vmem>>, %arg8: memref<16x1xf32, #tpu.memory_space<vmem>>, %arg9: memref<1x16x256xf32, #tpu.memory_space<vmem>>) attributes {dimension_semantics = [#tpu.dimension_semantics<parallel>], iteration_bounds = array<i64: 2>, scalar_prefetch = 0 : i64, scratch_operands = 0 : i64, tpu.core_type = #tpu.core_type<tc>, window_params = [{transform_indices = @transform_0, window_bounds = array<i64: 1, 8, 256>}, {transform_indices = @transform_1, window_bounds = array<i64: 1, 8, 256>}, {pipeline_mode = #tpu.pipeline_mode<synchronous>, transform_indices = @transform_2, window_bounds = array<i64: 16, 8>}, {pipeline_mode = #tpu.pipeline_mode<synchronous>, transform_indices = @transform_3, window_bounds = array<i64: 16, 8>}, {pipeline_mode = #tpu.pipeline_mode<synchronous>, transform_indices = @transform_4, window_bounds = array<i64: 16, 1>}, {pipeline_mode = #tpu.pipeline_mode<synchronous>, transform_indices = @transform_5, window_bounds = array<i64: 16, 8>}, {pipeline_mode = #tpu.pipeline_mode<synchronous>, transform_indices = @transform_6, window_bounds = array<i64: 16, 8>}, {pipeline_mode = #tpu.pipeline_mode<synchronous>, transform_indices = @transform_7, window_bounds = array<i64: 16, 1>}, {transform_indices = @transform_8, window_bounds = array<i64: 1, 16, 256>}]} {
    %c0 = arith.constant 0 : index
    %c0_0 = arith.constant 0 : index
    %c0_1 = arith.constant 0 : index
    %0 = vector.load %arg1[%c0, %c0_0, %c0_1] : memref<1x8x256xf32, #tpu.memory_space<vmem>>, vector<1x8x256xf32>
    %1 = vector.shape_cast %0 : vector<1x8x256xf32> to vector<8x256xf32>
    %c0_2 = arith.constant 0 : index
    %c0_3 = arith.constant 0 : index
    %c0_4 = arith.constant 0 : index
    %2 = vector.load %arg2[%c0_2, %c0_3, %c0_4] : memref<1x8x256xf32, #tpu.memory_space<vmem>>, vector<1x8x256xf32>
    %3 = vector.shape_cast %2 : vector<1x8x256xf32> to vector<8x256xf32>
    %cst = arith.constant dense<0.000000e+00> : vector<8xf32>
    %4 = vector.multi_reduction <add>, %1, %cst [1] : vector<8x256xf32> to vector<8xf32>
    %5 = vector.shape_cast %4 : vector<8xf32> to vector<8x1xf32>
    %cst_5 = arith.constant 3.906250e-03 : f32
    %6 = vector.broadcast %cst_5 : f32 to vector<8x1xf32>
    %7 = arith.mulf %5, %6 : vector<8x1xf32>
    %cst_6 = arith.constant dense<0.000000e+00> : vector<8xf32>
    %8 = vector.multi_reduction <add>, %3, %cst_6 [1] : vector<8x256xf32> to vector<8xf32>
    %9 = vector.shape_cast %8 : vector<8xf32> to vector<8x1xf32>
    %cst_7 = arith.constant 3.906250e-03 : f32
    %10 = vector.broadcast %cst_7 : f32 to vector<8x1xf32>
    %11 = arith.mulf %9, %10 : vector<8x1xf32>
    %c0_8 = arith.constant 0 : index
    %c0_9 = arith.constant 0 : index
    %12 = vector.load %arg3[%c0_8, %c0_9] : memref<16x8xf32, #tpu.memory_space<vmem>>, vector<16x8xf32>
    %cst_10 = arith.constant dense<0.000000e+00> : vector<16x1xf32>
    %13 = tpu.matmul %12, %7, %cst_10 {dimension_numbers = #tpu.dot_dimension_numbers<[1], [0], [0], [1], [0, 0, 1, 1], [], []>} : vector<16x8xf32>, vector<8x1xf32>, vector<16x1xf32> -> vector<16x1xf32>
    %c0_11 = arith.constant 0 : index
    %c0_12 = arith.constant 0 : index
    %14 = vector.load %arg4[%c0_11, %c0_12] : memref<16x8xf32, #tpu.memory_space<vmem>>, vector<16x8xf32>
    %cst_13 = arith.constant dense<0.000000e+00> : vector<16x1xf32>
    %15 = tpu.matmul %14, %11, %cst_13 {dimension_numbers = #tpu.dot_dimension_numbers<[1], [0], [0], [1], [0, 0, 1, 1], [], []>} : vector<16x8xf32>, vector<8x1xf32>, vector<16x1xf32> -> vector<16x1xf32>
    %16 = arith.addf %13, %15 : vector<16x1xf32>
    %c0_14 = arith.constant 0 : index
    %c0_15 = arith.constant 0 : index
    %17 = vector.load %arg5[%c0_14, %c0_15] : memref<16x1xf32, #tpu.memory_space<vmem>>, vector<16x1xf32>
    %18 = arith.addf %16, %17 : vector<16x1xf32>
    %19 = arith.negf %18 : vector<16x1xf32>
    %20 = math.exp %19 : vector<16x1xf32>
    %cst_16 = arith.constant 1.000000e+00 : f32
    %21 = vector.broadcast %cst_16 : f32 to vector<16x1xf32>
    %22 = arith.addf %21, %20 : vector<16x1xf32>
    %23 = arith.divf %21, %22 : vector<16x1xf32>
    %24 = tpu.iota {dimensions = array<i32: 0>} : vector<16x16xi32>
    %25 = tpu.iota {dimensions = array<i32: 1>} : vector<16x16xi32>
    %26 = arith.cmpi eq, %24, %25 : vector<16x16xi32>
    %cst_17 = arith.constant 0.000000e+00 : f32
    %27 = vector.shape_cast %23 : vector<16x1xf32> to vector<16x1xf32>
    %28 = vector.broadcast %27 : vector<16x1xf32> to vector<16x16xf32>
    %29 = vector.broadcast %cst_17 : f32 to vector<16x16xf32>
    %30 = arith.select %26, %28, %29 : vector<16x16xi1>, vector<16x16xf32>
    %cst_18 = arith.constant dense<0.000000e+00> : vector<16xf32>
    %31 = vector.multi_reduction <add>, %30, %cst_18 [0] : vector<16x16xf32> to vector<16xf32>
    %32 = vector.shape_cast %31 : vector<16xf32> to vector<1x16xf32>
    %c0_19 = arith.constant 0 : index
    %c0_20 = arith.constant 0 : index
    %33 = vector.load %arg6[%c0_19, %c0_20] : memref<16x8xf32, #tpu.memory_space<vmem>>, vector<16x8xf32>
    %34 = vector.extract_strided_slice %32 {offsets = [0, 0], sizes = [1, 8], strides = [1, 1]} : vector<1x16xf32> to vector<1x8xf32>
    %35 = vector.broadcast %34 : vector<1x8xf32> to vector<16x8xf32>
    %36 = arith.mulf %33, %35 : vector<16x8xf32>
    %c0_21 = arith.constant 0 : index
    %c0_22 = arith.constant 0 : index
    %37 = vector.load %arg7[%c0_21, %c0_22] : memref<16x8xf32, #tpu.memory_space<vmem>>, vector<16x8xf32>
    %38 = vector.extract_strided_slice %32 {offsets = [0, 8], sizes = [1, 8], strides = [1, 1]} : vector<1x16xf32> to vector<1x8xf32>
    %39 = vector.broadcast %38 : vector<1x8xf32> to vector<16x8xf32>
    %40 = arith.mulf %37, %39 : vector<16x8xf32>
    %cst_23 = arith.constant dense<0.000000e+00> : vector<16x256xf32>
    %41 = tpu.matmul %36, %1, %cst_23 {dimension_numbers = #tpu.dot_dimension_numbers<[1], [0], [0], [1], [0, 0, 1, 1], [], []>} : vector<16x8xf32>, vector<8x256xf32>, vector<16x256xf32> -> vector<16x256xf32>
    %cst_24 = arith.constant dense<0.000000e+00> : vector<16x256xf32>
    %42 = tpu.matmul %40, %3, %cst_24 {dimension_numbers = #tpu.dot_dimension_numbers<[1], [0], [0], [1], [0, 0, 1, 1], [], []>} : vector<16x8xf32>, vector<8x256xf32>, vector<16x256xf32> -> vector<16x256xf32>
    %43 = arith.addf %41, %42 : vector<16x256xf32>
    %c0_25 = arith.constant 0 : index
    %c0_26 = arith.constant 0 : index
    %44 = vector.load %arg8[%c0_25, %c0_26] : memref<16x1xf32, #tpu.memory_space<vmem>>, vector<16x1xf32>
    %45 = vector.broadcast %44 : vector<16x1xf32> to vector<16x256xf32>
    %46 = arith.addf %43, %45 : vector<16x256xf32>
    %47 = vector.extract_strided_slice %46 {offsets = [0, 0], sizes = [8, 256], strides = [1, 1]} : vector<16x256xf32> to vector<8x256xf32>
    %48 = arith.addf %47, %1 : vector<8x256xf32>
    %cst_27 = arith.constant 0.000000e+00 : f32
    %49 = vector.broadcast %cst_27 : f32 to vector<8x256xf32>
    %50 = arith.maximumf %48, %49 : vector<8x256xf32>
    %c0_28 = arith.constant 0 : index
    %c0_29 = arith.constant 0 : index
    %c0_30 = arith.constant 0 : index
    %51 = vector.load %arg9[%c0_28, %c0_29, %c0_30] : memref<1x16x256xf32, #tpu.memory_space<vmem>>, vector<1x8x256xf32>
    %52 = vector.shape_cast %51 : vector<1x8x256xf32> to vector<8x256xf32>
    %53 = vector.shape_cast %50 : vector<8x256xf32> to vector<1x8x256xf32>
    tpu.vector_store %arg9[%c0_28, %c0_29, %c0_30], %53 {strides = array<i32>} : memref<1x16x256xf32, #tpu.memory_space<vmem>>, vector<1x8x256xf32>,
    %54 = vector.extract_strided_slice %46 {offsets = [8, 0], sizes = [8, 256], strides = [1, 1]} : vector<16x256xf32> to vector<8x256xf32>
    %55 = arith.addf %54, %3 : vector<8x256xf32>
    %cst_31 = arith.constant 0.000000e+00 : f32
    %56 = vector.broadcast %cst_31 : f32 to vector<8x256xf32>
    %57 = arith.maximumf %55, %56 : vector<8x256xf32>
    %c0_32 = arith.constant 0 : index
    %c8 = arith.constant 8 : index
    %c0_33 = arith.constant 0 : index
    %58 = vector.load %arg9[%c0_32, %c8, %c0_33] : memref<1x16x256xf32, #tpu.memory_space<vmem>>, vector<1x8x256xf32>
    %59 = vector.shape_cast %58 : vector<1x8x256xf32> to vector<8x256xf32>
    %60 = vector.shape_cast %57 : vector<8x256xf32> to vector<1x8x256xf32>
    tpu.vector_store %arg9[%c0_32, %c8, %c0_33], %60 {strides = array<i32>} : memref<1x16x256xf32, #tpu.memory_space<vmem>>, vector<1x8x256xf32>,
    return
  }
  func.func @transform_0(%arg0: i32) -> (i32, i32, i32) {
    %c0_i32 = arith.constant 0 : i32
    %c0_i32_0 = arith.constant 0 : i32
    %c0_i32_1 = arith.constant 0 : i32
    return %arg0, %c0_i32, %c0_i32_0 : i32, i32, i32
  }
  func.func @transform_1(%arg0: i32) -> (i32, i32, i32) {
    %c0_i32 = arith.constant 0 : i32
    %c0_i32_0 = arith.constant 0 : i32
    %c0_i32_1 = arith.constant 0 : i32
    return %arg0, %c0_i32, %c0_i32_0 : i32, i32, i32
  }
  func.func @transform_2(%arg0: i32) -> (i32, i32) {
    %c0_i32 = arith.constant 0 : i32
    %c0_i32_0 = arith.constant 0 : i32
    %c0_i32_1 = arith.constant 0 : i32
    return %c0_i32, %c0_i32_0 : i32, i32
  }
  func.func @transform_3(%arg0: i32) -> (i32, i32) {
    %c0_i32 = arith.constant 0 : i32
    %c0_i32_0 = arith.constant 0 : i32
    %c0_i32_1 = arith.constant 0 : i32
    return %c0_i32, %c0_i32_0 : i32, i32
  }
  func.func @transform_4(%arg0: i32) -> (i32, i32) {
    %c0_i32 = arith.constant 0 : i32
    %c0_i32_0 = arith.constant 0 : i32
    %c0_i32_1 = arith.constant 0 : i32
    return %c0_i32, %c0_i32_0 : i32, i32
  }
  func.func @transform_5(%arg0: i32) -> (i32, i32) {
    %c0_i32 = arith.constant 0 : i32
    %c0_i32_0 = arith.constant 0 : i32
    %c0_i32_1 = arith.constant 0 : i32
    return %c0_i32, %c0_i32_0 : i32, i32
  }
  func.func @transform_6(%arg0: i32) -> (i32, i32) {
    %c0_i32 = arith.constant 0 : i32
    %c0_i32_0 = arith.constant 0 : i32
    %c0_i32_1 = arith.constant 0 : i32
    return %c0_i32, %c0_i32_0 : i32, i32
  }
  func.func @transform_7(%arg0: i32) -> (i32, i32) {
    %c0_i32 = arith.constant 0 : i32
    %c0_i32_0 = arith.constant 0 : i32
    %c0_i32_1 = arith.constant 0 : i32
    return %c0_i32, %c0_i32_0 : i32, i32
  }
  func.func @transform_8(%arg0: i32) -> (i32, i32, i32) {
    %c0_i32 = arith.constant 0 : i32
    %c0_i32_0 = arith.constant 0 : i32
    %c0_i32_1 = arith.constant 0 : i32
    return %arg0, %c0_i32, %c0_i32_0 : i32, i32, i32
  }
}

</mosaic_0001>

<bundles_post_ra>
// kernel: tpu_custom_call.1
= control target key start
LH: loop header
LB: loop body
LE: loop exit
PB: predicated region body
PF: predicated region fallthrough
CT: control target
= control target key end

     0   :  { %13 = vsyncpa [#allocation3], 0  ;;  %s1238_s0 = inlined_call_operand.vmem [shape: f32[2,8,256], index: 0, kind: input, shape index: {}]   ;;  %s1239_s1 = inlined_call_operand.vmem [shape: f32[2,8,256], index: 1, kind: input, shape index: {}]   ;;  %s1240_s2 = inlined_call_operand.vmem [shape: f32[16,8], index: 2, kind: input, shape index: {}]   ;;  %s1241_s3 = inlined_call_operand.vmem [shape: f32[16,8], index: 3, kind: input, shape index: {}]   ;;  %s1242_s4 = inlined_call_operand.vmem [shape: f32[16,1], index: 4, kind: input, shape index: {}]   ;;  %s1243_s5 = inlined_call_operand.vmem [shape: f32[16,8], index: 5, kind: input, shape index: {}]   ;;  %s1244_s6 = inlined_call_operand.vmem [shape: f32[16,8], index: 6, kind: input, shape index: {}]   ;;  %s1245_s7 = inlined_call_operand.vmem [shape: f32[16,1], index: 7, kind: input, shape index: {}]   ;;  %s1246_s8 = inlined_call_operand.hbm [shape: f32[2,16,256], index: 8, kind: output, shape index: {}]  }
   0x1   :  { %15 = vsyncpa [#allocation3 + $0x1], 0  ;;  %s1062_s27 = smov 0   ;;  %s1064_s28 = smov 0  }
   0x2   :  { %s1066_s29 = smov 0   ;;  %s1068_s30 = smov 0  }
   0x3 LB: > { %s1083_s9 = sadd.s32 4294967295, %s1009_s30   ;;  %s842_s10 = sadd.s32 4294967294, %s1009_s30   ;;  %s1009_s30 = sphi %s1068_s30, %s1252_s30   ;;  %s1005_s29 = sphi %s1066_s29, %s1251_s29   ;;  %s1001_s28 = sphi %s1064_s28, %s1250_s28   ;;  %s997_s27 = sphi %s1062_s27, %s1249_s27  }
   0x4   : > { %s1087_s11 = sadd.s32 1, %s1009_s30   ;;  %s206_s12 = sadd.s32 1, %s1005_s29 }
   0x5   : > { %s203_s13 = ssub.s32 %s1009_s30, %s1087_s11  ;;  %p216_p0 = scmp.ne.s32.totalorder %s1005_s29, %s1001_s28 }
   0x6   : > { %p204_p1 = scmp.eq.s32.totalorder %s203_s13, 0  ;;  %p217_p2 = scmp.eq.s32.totalorder %s1083_s9, 1 }
   0x7   : > { %p222_p3 = scmp.ne.s32.totalorder %s1001_s28, %s997_s27  ;;  %p223_p4 = scmp.eq.s32.totalorder %s842_s10, 1 }
   0x8   : > { %s1098_s14 = scalar_select %p204_p1, %s1005_s29, %s206_s12  }
   0x9   : > { %p1100_p5 = por %p217_p2, %p216_p0  ;;  %p1104_p6 = por %p223_p4, %p222_p3 }
   0xa   : > { %p845_p7 = scmp.ge.s32.totalorder %s1009_s30, 1  ;;  %p275_p8 = scmp.lt.s32.totalorder %s1009_s30, 3 }
   0xc   : > { %p276_p9 = pnand %p845_p7, %p275_p8 }
   0xd   : > { %p314_p10 = scmp.lt.s32.totalorder (!%p276_p9), %s1083_s9, 1  ;;  %v338_v6 = vld [vmem:[%s1241_s3] sm:$0xff] (!%p276_p9)  ;;  %vm340_vm0 = vcmask (!%p276_p9), 64512   ;;  %v339_v9 = vld [vmem:[%s1241_s3 + $0x8] sm:$0xff] (!%p276_p9)  ;;  %v1011_v14 = vmov (!%p276_p9), 0   ;;  %v519_v31 = vlaneseq (!%p276_p9)  ;;  %vm538_vm3 = vcmask (!%p276_p9), 130048  }
   0xe   : > { %279 = sbr.rel (%p276_p9) target bundleno = 930 (0x3a2), region = 52  ;;  %877 = vmatprep.mubr.msk.f32.mxu0 (!%p276_p9), %vm340_vm0, %v338_v6  ;;  %v336_v10 = vld [vmem:[%s1240_s2] sm:$0xff] (!%p276_p9)  ;;  %v337_v13 = vld [vmem:[%s1240_s2 + $0x8] sm:$0xff] (!%p276_p9)  ;;  %937 = vset.pattern.permute.xlu1 (!%p276_p9), %v1011_v14  ;;  %v1012_v43 = vmov (!%p276_p9), 0.0   ;;  %s1013_s12 = smov (!%p276_p9), 120  }
   0xf   : > { %938 = vset.pattern.permute.xlu0 (!%p276_p9), %v1011_v14  ;;  %v504_v15 = vld [vmem:[%s1242_s4 + $0x8] sm:$0xff] (!%p276_p9)  ;;  %v503_v16 = vld [vmem:[%s1242_s4] sm:$0xff] (!%p276_p9)  ;;  %v520_v32 = vshrl.u32 (!%p276_p9), %v519_v31, 7  ;;  %v523_v33 = vand.u32 (!%p276_p9), 127, %v519_v31  ;;  %636 = vmatprep.mubr.f32.mxu1 (!%p276_p9), %v1012_v43  ;;  %s1014_s20 = smov (!%p276_p9), [#allocation2]  }
  0x10   : > { %v726_v29 = vld [vmem:[%s1245_s7] sm:$0xff] (!%p276_p9)  ;;  %v727_v30 = vld [vmem:[%s1245_s7 + $0x8] sm:$0xff] (!%p276_p9) }
  0x11   : > { %v521_v34 = vadd.s32 (!%p276_p9), 8, %v520_v32  ;;  %vm524_vm1 = vcmp.eq.s32.totalorder (!%p276_p9), %v520_v32, %v523_v33  ;;  %v552_v49 = vld [vmem:[%s1244_s6] sm:$0xff] (!%p276_p9)  ;;  %v553_v50 = vld [vmem:[%s1244_s6 + $0x8] sm:$0xff] (!%p276_p9) }
  0x12   : > { %v548_v54 = vld [vmem:[%s1243_s5] sm:$0xff] (!%p276_p9)  ;;  %v549_v56 = vld [vmem:[%s1243_s5 + $0x8] sm:$0xff] (!%p276_p9) }
  0x13   : > { %vm525_vm2 = vcmp.eq.s32.totalorder (!%p276_p9), %v521_v34, %v523_v33 }
  0x15   : > { %s315_s17 = scalar_select %p314_p10, %s1083_s9, 1 }
  0x17   : > { %s866_s18 = sshll.u32 %s315_s17, 4 }
  0x18   : > { %s323_s21 = scalar_lea.vmem %s1239_s1, %s866_s18  ;;  %s318_s24 = scalar_lea.vmem %s1238_s0, %s866_s18 }
  0x19   : > { %v1118_v0 = vld [vmem:[%s323_s21] sm:$0xff]  ;;  %v1120_v1 = vld [vmem:[%s323_s21 + $0x8] sm:$0xff]  ;;  %s951_s21 = sshll.u32 %s1014_s20, 4  ;;  %s952_s21 = int_to_ptr.vmem [resolvable:$false] %s951_s21 }
  0x1a   : > { %v1122_v2 = vld [vmem:[%s318_s24] sm:$0xff]  ;;  %v332_v3 = vadd.f32 %v1120_v1, %v1118_v0  ;;  %v1126_v4 = vld [vmem:[%s318_s24 + $0x8] sm:$0xff]  ;;  %885 = vmatprep.subr.mxu1 %v1120_v1  ;;  %s311_s24 = sand.u32 1, %s1001_s28   ;;  %s953_s22 = scalar_lea.vmem %s952_s21, 1024 }
  0x1b   : > { %886 = vmatpush1.msra.mxu1 %v1118_v0  ;;  %v328_v5 = vadd.f32 %v1126_v4, %v1122_v2  ;;  %s846_s25 = sshll.u32 %s311_s24, 5 }
  0x1c   : > { %333 = vadd.xlane.f32.xlu0 %v332_v3  ;;  %649 = vmatprep.subr.mxu1 %v1126_v4  ;;  %s313_s26 = scalar_lea.vmem [#allocation2], %s846_s25 }
  0x1d   : > { %s768_s10 = sshll.u32 %s313_s26, 4  ;;  %s1193_s10 = int_to_ptr.vmem [resolvable:$true] %s768_s10 }
  0x1e   : > { %s947_s19 = scalar_lea.vmem %s1193_s10, 512  ;;  %p954_p0 = scmp.lt.s32.totalorder %s1193_s10, %s952_s21 }
  0x1f   : > { %p948_p11 = scmp.ne.s32.totalorder %s1193_s10, %s947_s19  ;;  %p955_p1 = scmp.lt.s32.totalorder %s953_s22, %s947_s19 }
  0x20   : > { %329 = vadd.xlane.f32.xlu0 %v328_v5 }
  0x21   : > { %p949_p12 = pnand %p948_p11, %p1100_p5  ;;  %p956_p2 = por %p955_p1, %p954_p0 }
  0x23   : > { %p950_p13 = pneg %p949_p12 }
  0x25   : > { %p957_p3 = pnand %p956_p2, %p950_p13 }
  0xa9   : > { %v334_v7 = vpop.xlane.xlu0 %333 }
  0xaa   : > { %v335_v8 = vmul.f32 0.00390625, %v334_v7 }
  0xac   : > { %875 = vmatprep.subr.mxu0 %v335_v8 }
  0xad   : > { %876 = vmatpush3.msra.mxu0 %v335_v8  ;;  %v330_v11 = vpop.xlane.xlu0 %329 }
  0xae   : > { %v331_v12 = vmul.f32 0.00390625, %v330_v11  ;;  %878 = vmatmul.mubr.msk.f32.vlgmr.msra.gmra.mrb[0].mxu0 %vm340_vm0, %v339_v9 }
  0xaf   : > { %882 = vmatprep.mubr.msk.f32.mxu0 %vm340_vm0, %v336_v10 }
  0xb0   : > { %880 = vmatprep.subr.mxu0 %v331_v12 }
  0xb1   : > { %881 = vmatpush3.msra.mxu0 %v331_v12 }
  0xb2   : > { %566 = vmatprep.subr.mxu0 %v1120_v1 }
  0xb6   : > { %883 = vmatmul.mubr.msk.f32.vlgmr.msra.gmra.mrb[0].mxu0 %vm340_vm0, %v337_v13 }
  0xb7   : > { %567 = vmatpush1.msra.mxu0 %v1118_v0  ;;  %630 = vmatprep.mubr.f32.mxu0 %v1012_v43 }
 0x189   : > { %v884_v17 = vpop.f32.mrb[0].mxu0 }
 0x18a   : > { %v506_v18 = vadd.f32 %v884_v17, %v504_v15  ;;  %v494_v19 = vpop.f32.mrb[1].mxu0 }
 0x18b   : > { %v505_v20 = vadd.f32 %v503_v16, %v494_v19 }
 0x18c   : > { %v856_v21 = vmul.f32 -1.442695, %v506_v18 }
 0x18d   : > { %v855_v22 = vmul.f32 -1.442695, %v505_v20 }
 0x18e   : > { %939 = vpow2.f32 %v856_v21 }
 0x18f   : > { %941 = vpow2.f32 %v855_v22 }
 0x198   : > { %v940_v23 = vpop.eup %939 }
 0x199   : > { %v942_v24 = vpop.eup %941  ;;  %v514_v26 = vadd.f32 1.0, %v940_v23 }
 0x19a   : > { %v513_v25 = vadd.f32 1.0, %v942_v24 }
 0x19c   : > { %943 = vrcp.f32 %v513_v25 }
 0x19d   : > { %945 = vrcp.f32 %v514_v26 }
 0x1a6   : > { %v944_v27 = vpop.eup %943 }
 0x1a7   : > { %528 = vperm.xlu1 %937, %v944_v27   ;;  %v946_v28 = vpop.eup %945 }
 0x1ab   : > { %533 = vperm.xlu1 %937, %v946_v28  }
 0x1af   : > { %730 = vperm.xlu1 %937, %v726_v29  }
 0x1b3   : > { %735 = vperm.xlu1 %937, %v727_v30  }
 0x226   : > { %v529_v35 = vpop.permute.xlu1 %528 }
 0x227   : > { %v536_v36 = vsel %vm524_vm1, %v529_v35, 0.0 }
 0x228   : > { %v539_v39 = vsel %vm538_vm3, %v536_v36, 0.0 }
 0x22a   : > { %v534_v37 = vpop.permute.xlu1 %533 }
 0x22b   : > { %v537_v38 = vsel %vm525_vm2, %v534_v37, 0.0 }
 0x22c   : > { %v540_v40 = vsel %vm538_vm3, %v537_v38, 0.0 }
 0x22d   : > { %v541_v41 = vadd.f32 %v540_v40, %v539_v39 }
 0x22e   : > { %v731_v60 = vpop.permute.xlu1 %730 }
 0x22f   : > { %v542_v42 = vrot.slane %v541_v41, 4 }
 0x231   : > { %v543_v44 = vadd.f32 %v542_v42, %v541_v41 }
 0x232   : > { %v736_v6 = vpop.permute.xlu1 %735 }
 0x233   : > { %v544_v45 = vrot.slane %v543_v44, 2 }
 0x235   : > { %v545_v46 = vadd.f32 %v544_v45, %v543_v44 }
 0x237   : > { %v546_v47 = vrot.slane %v545_v46, 1 }
 0x239   : > { %v547_v48 = vadd.f32 %v546_v47, %v545_v46 }
 0x23b   : > { %555 = vrot.lane.b32.xlu0 %v547_v48, %s1013_s12  ;;  %v550_v55 = vmul.f32 %v548_v54, %v547_v48  ;;  %v551_v57 = vmul.f32 %v549_v56, %v547_v48  ;;  %s868_s12 = sshll.u32 %s1083_s9, 9  ;;  %s1197_s9 = scalar_lea.sflag [#allocation3], %s311_s24 }
 0x23c   : > { %s1191_s18 = scalar_lea.hbm %s1246_s8, %s868_s12 }
 0x2ad   : > { %v556_v51 = vpop.permute.xlu0 %555 }
 0x2ae   : > { %v558_v52 = vmul.f32 %v556_v51, %v552_v49  ;;  %v559_v53 = vmul.f32 %v556_v51, %v553_v50 }
 0x2b0   : > { %857 = vmatmul.mubr.msk.f32.vlgmr.msra.gmra.mrb[2].mxu0 %vm340_vm0, %v558_v52  ;;  %858 = vmatmul.mubr.msk.f32.vlgmr.msra.gmra.mrb[0].mxu1 %vm340_vm0, %v559_v53 }
 0x2b1   : > { %650 = vmatpush1.msra.mxu1 %v1122_v2  ;;  %713 = vmatprep.mubr.f32.mxu1 %v1012_v43 }
 0x2b4   : > { %859 = vmatmul.mubr.msk.f32.vlgmr.msra.gmra.mrb[2].mxu1 %vm340_vm0, %v550_v55 }
 0x2b5   : > { %719 = vmatprep.mubr.f32.mxu1 %v1012_v43 }
 0x2b8   : > { %860 = vmatmul.mubr.msk.f32.gmra.mrb[0].mxu1 %vm340_vm0, %v551_v57 }
 0x383   : > { %v632_v58 = vpop.f32.mrb[2].mxu0 }
 0x384   : > { %v634_v59 = vpop.f32.mrb[3].mxu0 }
 0x387   : > { %v715_v61 = vpop.f32.mrb[2].mxu1 }
 0x388   : > { %v716_v62 = vadd.f32 %v715_v61, %v632_v58  ;;  %v717_v63 = vpop.f32.mrb[3].mxu1 }
 0x389   : > { %v718_v3 = vadd.f32 %v717_v63, %v634_v59 }
 0x38a   : > { %v738_v5 = vadd.f32 %v731_v60, %v716_v62 }
 0x38b   : > { %v739_v7 = vadd.f32 %v731_v60, %v718_v3  ;;  %v721_v8 = vpop.f32.mrb[0].mxu1 }
 0x38c   : > { %v742_v9 = vadd.f32 %v738_v5, %v1122_v2  ;;  %v740_v10 = vadd.f32 %v736_v6, %v721_v8  ;;  %v723_v11 = vpop.f32.mrb[1].mxu1 }
 0x38d   : > { %v743_v12 = vadd.f32 %v739_v7, %v1126_v4  ;;  %v741_v13 = vadd.f32 %v736_v6, %v723_v11 }
 0x38e   : > { %v744_v14 = vmax.f32 %v742_v9, 0.0  ;;  %v748_v15 = vadd.f32 %v740_v10, %v1118_v0 }
 0x38f   : > { %v745_v16 = vmax.f32 %v743_v12, 0.0  ;;  %v749_v17 = vadd.f32 %v741_v13, %v1120_v1 }
 0x390   : > { %746 = vst [vmem:[%s313_s26] sm:$0xff] %v744_v14  ;;  %v750_v18 = vmax.f32 %v748_v15, 0.0 }
 0x391   : > { %747 = vst [vmem:[%s313_s26 + $0x8] sm:$0xff] %v745_v16  ;;  %v751_v2 = vmax.f32 %v749_v17, 0.0 }
 0x392   : > { %752 = vst [vmem:[%s313_s26 + $0x10] sm:$0xff] %v750_v18 }
 0x393   : > { %753 = vst [vmem:[%s313_s26 + $0x18] sm:$0xff] %v751_v2 }
 0x394   : > { %960 = shalt.err (!%p957_p3)
}
 0x395   : > { %s961_s23 = scalar_lea.hbm %s1191_s18, 512  ;;  %s965_s26 = scalar_lea.hbm %s1246_s8, 1024 }
 0x396   : > { %p962_p4 = scmp.ne.s32.totalorder %s1191_s18, %s961_s23  ;;  %p966_p9 = scmp.lt.u32.totalorder %s1191_s18, %s1246_s8 }
 0x397   : > { %p967_p10 = scmp.lt.u32.totalorder %s965_s26, %s961_s23  ;;  %p969_p12 = scmp.lt.u32.totalorder %s961_s23, %s1191_s18 }
 0x398   : > { %p963_p7 = pnand %p962_p4, %p1100_p5 }
 0x399   : > { %p968_p11 = por %p967_p10, %p966_p9 }
 0x39a   : > { %p964_p8 = pneg %p963_p7 }
 0x39b   : > { %p970_p13 = por %p969_p12, %p968_p11 }
 0x39d   : > { %p971_p0 = pnand %p970_p13, %p964_p8 }
 0x39f   : > { %974 = shalt.err (!%p971_p0)
}
 0x3a0   : > { %s1015_s17 = smov 256   ;;  %s1016_s19 = smov 16  }
 0x3a1   : > { %893 = dma.vmem_to_hbm [thread:$0]  (%p1100_p5), %s1193_s10, 512, %s1191_s18, %s1197_s9, %s1015_s17, %s1015_s17, %s1016_s19  }
 0x3a2 PF: > { %p899_p1 = scmp.ge.s32.totalorder %s1009_s30, 2  ;;  %s783_s20 = sand.u32 1, %s997_s27  }
 0x3a3   : > { %s784_s21 = scalar_lea.sflag [#allocation3], %s783_s20 }
 0x3a4   : > { %p896_p2 = pnand %p899_p1, %p1104_p6 }
 0x3a6   : > { %992 = dma.done.wait (!%p896_p2), %s784_s21, 512  }
 0x3a7   : > { %994 = vsyncadd (!%p896_p2), %s784_s21, 4294966784  ;;  %p18_p3 = scmp.ge.s32.totalorder %s1087_s11, 4   ;;  %s1249_s27 = smov %s1001_s28 }
 0x3a8   : > { %s1250_s28 = smov %s1005_s29  ;;  %s1251_s29 = smov %s1098_s14 }
 0x3a9   : > { %s1252_s30 = smov %s1087_s11  ;;  %20 = sbr.rel (!%p18_p3) target bundleno = 3 (0x3), region = 90 }
 0x3b0   :  { %789 = vsyncpa [#allocation3], 1 }
 0x3b1   :  { %791 = vsyncpa [#allocation3 + $0x1], 1 }

</bundles_post_ra>
